<compile_context>
chip_gen: v5e
topology: v5e:2x2
jax: 0.10.0
libtpu: 0.0.40
codegen_flags: <defaults>
</compile_context>

<pallas_src>
import functools

import jax
import jax.numpy as jnp
from jax.experimental import pallas as pl
from jax.experimental.pallas import tpu as pltpu


def _round_up(x: int, m: int) -> int:
    return ((x + m - 1) // m) * m


def _fcseq_kernel(act_fn, b_ref, x_ref, w0_ref, w1_ref, o_ref):
    # Scalar biases from SMEM — cheap scalar loads, hoisted ahead of the matmuls.
    b0 = b_ref[0]
    b1 = b_ref[1]

    # Layer 0: bf16 MXU matmul with f32 accumulation; bias + activation epilogue in f32.
    h = jnp.dot(x_ref[...], w0_ref[...], preferred_element_type=jnp.float32)
    h = act_fn(h + b0)

    # Layer 1: cast the f32 intermediate back to bf16 for the MXU, accumulate in f32.
    y = jnp.dot(h.astype(jnp.bfloat16), w1_ref[...], preferred_element_type=jnp.float32)
    y = act_fn(y + b1)

    o_ref[...] = y.astype(o_ref.dtype)


def fcseq_forward(x, w0_t, w1_t, biases, *, act_fn=None, tb=None):
    """FCSeq forward.

    x:      [B, F]  f32
    w*_t:   [F, F]  f32, stored as [in_features, out_features] (transpose of nn.Linear weight)
    biases: [2]     f32 scalar biases (one per layer)
    """
    if act_fn is None:
        act_fn = lambda v: jnp.maximum(v, 0.0)  # ReLU

    B, F = x.shape
    Fp = _round_up(F, 128)  # lane-dense feature dim

    # Row tile: >=256 rows per MXU push when the batch allows it; otherwise round the batch up
    # to 16 sublanes (bf16 input packing).
    if tb is None:
        if B >= 512:
            tb = 512
        elif B >= 256:
            tb = 256
        else:
            tb = _round_up(B, 16)
    Bp = _round_up(B, tb)

    # Zero-padding is exact for this op: padded weight rows/cols are zero, so real output columns
    # are unaffected; padded rows/columns are sliced off below.
    xp = jnp.zeros((Bp, Fp), jnp.bfloat16).at[:B, :F].set(x.astype(jnp.bfloat16))
    w0p = jnp.zeros((Fp, Fp), jnp.bfloat16).at[:F, :F].set(w0_t.astype(jnp.bfloat16))
    w1p = jnp.zeros((Fp, Fp), jnp.bfloat16).at[:F, :F].set(w1_t.astype(jnp.bfloat16))

    grid = (Bp // tb,)

    # VMEM budget: resident bf16 weights (x2 buffers each) + double-buffered bf16 x tiles +
    # double-buffered f32 out tiles + headroom; clamp to v7x's 64 MiB physical VMEM.
    vmem_bytes = 2 * (2 * Fp * Fp * 2) + 2 * (tb * Fp * 2) + 2 * (tb * Fp * 4) + (8 << 20)
    vmem_bytes = max(vmem_bytes, 32 << 20)
    vmem_bytes = min(vmem_bytes, 64 << 20)

    out = pl.pallas_call(
        functools.partial(_fcseq_kernel, act_fn),
        out_shape=jax.ShapeDtypeStruct((Bp, Fp), jnp.float32),
        grid_spec=pltpu.PrefetchScalarGridSpec(
            num_scalar_prefetch=1,          # biases -> SMEM, also passed to every index_map
            grid=grid,
            in_specs=[
                pl.BlockSpec((tb, Fp), lambda i, b: (i, 0)),  # x row tile (pipelined)
                pl.BlockSpec((Fp, Fp), lambda i, b: (0, 0)),  # W0 resident across the grid
                pl.BlockSpec((Fp, Fp), lambda i, b: (0, 0)),  # W1 resident across the grid
            ],
            out_specs=pl.BlockSpec((tb, Fp), lambda i, b: (i, 0)),  # lane-dense out tile
        ),
        compiler_params=pltpu.CompilerParams(
            dimension_semantics=("parallel",),   # independent row tiles -> 2-TC shard on v7x
            vmem_limit_bytes=vmem_bytes,
        ),
    )(biases, xp, w0p, w1p)

    return out[:B, :F]


def reference_forward(x, w0_t, w1_t, biases):
    h = jnp.maximum(x @ w0_t + biases[0], 0.0)
    return jnp.maximum(h @ w1_t + biases[1], 0.0)


if __name__ == "__main__":
    key = jax.random.PRNGKey(0)
    k_x, k_w0, k_w1, k_b = jax.random.split(key, 4)

    B = 8    # batch
    F = 32   # input_output (in_features == out_features for both layers)

    x = jax.random.normal(k_x, (B, F), dtype=jnp.float32)

    # nn.Linear default init ~ U(-1/sqrt(in), 1/sqrt(in)); deterministic here.
    bound = 1.0 / jnp.sqrt(jnp.float32(F))
    # Stored already transposed to [in_features, out_features].
    w0_t = jax.random.uniform(k_w0, (F, F), jnp.float32, -bound, bound)
    w1_t = jax.random.uniform(k_w1, (F, F), jnp.float32, -bound, bound)

    # nn.init.uniform_ on (1,)-shaped bias tensors -> U(0, 1) scalars.
    biases = jax.random.uniform(k_b, (2,), jnp.float32, 0.0, 1.0)

    out = fcseq_forward(x, w0_t, w1_t, biases)
    out = jax.block_until_ready(out)

    ref = reference_forward(x, w0_t, w1_t, biases)
    assert out.shape == (B, F)
    # Tolerance relaxed vs. pure-f32: matmul inputs are bf16 (f32 accumulation on the MXU).
    assert jnp.allclose(out, ref, atol=2e-2, rtol=2e-2), float(jnp.max(jnp.abs(out - ref)))

    print("KERNEL_OK")
</pallas_src>

<mosaic_0001>
module attributes {stable_mosaic.version = 11 : i64} {
  func.func @_fcseq_kernel(%arg0: i32, %arg1: memref<2xf32, #tpu.memory_space<smem>>, %arg2: memref<16x128xbf16, #tpu.memory_space<vmem>>, %arg3: memref<128x128xbf16, #tpu.memory_space<vmem>>, %arg4: memref<128x128xbf16, #tpu.memory_space<vmem>>, %arg5: memref<16x128xf32, #tpu.memory_space<vmem>>) attributes {dimension_semantics = [#tpu.dimension_semantics<parallel>], iteration_bounds = array<i64: 1>, scalar_prefetch = 1 : i64, scratch_operands = 0 : i64, tpu.core_type = #tpu.core_type<tc>, window_params = [{transform_indices = @transform_0, window_bounds = array<i64: 16, 128>}, {pipeline_mode = #tpu.pipeline_mode<synchronous>, transform_indices = @transform_1, window_bounds = array<i64: 128, 128>}, {pipeline_mode = #tpu.pipeline_mode<synchronous>, transform_indices = @transform_2, window_bounds = array<i64: 128, 128>}, {transform_indices = @transform_3, window_bounds = array<i64: 16, 128>}]} {
    %c0 = arith.constant 0 : index
    %0 = memref.load %arg1[%c0] : memref<2xf32, #tpu.memory_space<smem>>
    %c1 = arith.constant 1 : index
    %1 = memref.load %arg1[%c1] : memref<2xf32, #tpu.memory_space<smem>>
    %c0_0 = arith.constant 0 : index
    %c0_1 = arith.constant 0 : index
    %2 = vector.load %arg2[%c0_0, %c0_1] : memref<16x128xbf16, #tpu.memory_space<vmem>>, vector<16x128xbf16>
    %c0_2 = arith.constant 0 : index
    %c0_3 = arith.constant 0 : index
    %3 = vector.load %arg3[%c0_2, %c0_3] : memref<128x128xbf16, #tpu.memory_space<vmem>>, vector<128x128xbf16>
    %cst = arith.constant dense<0.000000e+00> : vector<16x128xf32>
    %4 = tpu.matmul %2, %3, %cst {dimension_numbers = #tpu.dot_dimension_numbers<[1], [0], [0], [1], [0, 0, 1, 1], [], []>} : vector<16x128xbf16>, vector<128x128xbf16>, vector<16x128xf32> -> vector<16x128xf32>
    %5 = vector.broadcast %0 : f32 to vector<16x128xf32>
    %6 = arith.addf %4, %5 : vector<16x128xf32>
    %cst_4 = arith.constant 0.000000e+00 : f32
    %7 = vector.broadcast %cst_4 : f32 to vector<16x128xf32>
    %8 = arith.maximumf %6, %7 : vector<16x128xf32>
    %9 = arith.truncf %8 : vector<16x128xf32> to vector<16x128xbf16>
    %c0_5 = arith.constant 0 : index
    %c0_6 = arith.constant 0 : index
    %10 = vector.load %arg4[%c0_5, %c0_6] : memref<128x128xbf16, #tpu.memory_space<vmem>>, vector<128x128xbf16>
    %cst_7 = arith.constant dense<0.000000e+00> : vector<16x128xf32>
    %11 = tpu.matmul %9, %10, %cst_7 {dimension_numbers = #tpu.dot_dimension_numbers<[1], [0], [0], [1], [0, 0, 1, 1], [], []>} : vector<16x128xbf16>, vector<128x128xbf16>, vector<16x128xf32> -> vector<16x128xf32>
    %12 = vector.broadcast %1 : f32 to vector<16x128xf32>
    %13 = arith.addf %11, %12 : vector<16x128xf32>
    %cst_8 = arith.constant 0.000000e+00 : f32
    %14 = vector.broadcast %cst_8 : f32 to vector<16x128xf32>
    %15 = arith.maximumf %13, %14 : vector<16x128xf32>
    %c0_9 = arith.constant 0 : index
    %c0_10 = arith.constant 0 : index
    %16 = vector.load %arg5[%c0_9, %c0_10] : memref<16x128xf32, #tpu.memory_space<vmem>>, vector<16x128xf32>
    tpu.vector_store %arg5[%c0_9, %c0_10], %15 {strides = array<i32>} : memref<16x128xf32, #tpu.memory_space<vmem>>, vector<16x128xf32>,
    return
  }
  func.func @transform_0(%arg0: i32, %arg1: memref<2xf32, #tpu.memory_space<smem>>) -> (i32, i32) {
    %c0_i32 = arith.constant 0 : i32
    %c0_i32_0 = arith.constant 0 : i32
    return %arg0, %c0_i32 : i32, i32
  }
  func.func @transform_1(%arg0: i32, %arg1: memref<2xf32, #tpu.memory_space<smem>>) -> (i32, i32) {
    %c0_i32 = arith.constant 0 : i32
    %c0_i32_0 = arith.constant 0 : i32
    %c0_i32_1 = arith.constant 0 : i32
    return %c0_i32, %c0_i32_0 : i32, i32
  }
  func.func @transform_2(%arg0: i32, %arg1: memref<2xf32, #tpu.memory_space<smem>>) -> (i32, i32) {
    %c0_i32 = arith.constant 0 : i32
    %c0_i32_0 = arith.constant 0 : i32
    %c0_i32_1 = arith.constant 0 : i32
    return %c0_i32, %c0_i32_0 : i32, i32
  }
  func.func @transform_3(%arg0: i32, %arg1: memref<2xf32, #tpu.memory_space<smem>>) -> (i32, i32) {
    %c0_i32 = arith.constant 0 : i32
    %c0_i32_0 = arith.constant 0 : i32
    return %arg0, %c0_i32 : i32, i32
  }
}

</mosaic_0001>

<bundles_post_ra>
// kernel: tpu_custom_call.1
= control target key start
LH: loop header
LB: loop body
LE: loop exit
PB: predicated region body
PF: predicated region fallthrough
CT: control target
= control target key end

     0   :  { %s477_s18 = smov [#allocation3]   ;;  %s526_s0 = inlined_call_operand.hbm [shape: f32[2], index: 0, kind: input, shape index: {}]   ;;  %s527_s1 = inlined_call_operand.hbm [shape: bf16[16,128], index: 1, kind: input, shape index: {}]   ;;  %s528_s2 = inlined_call_operand.hbm [shape: bf16[128,128], index: 2, kind: input, shape index: {}]   ;;  %s529_s3 = inlined_call_operand.hbm [shape: bf16[128,128], index: 3, kind: input, shape index: {}]   ;;  %s530_s4 = inlined_call_operand.hbm [shape: f32[16,128], index: 4, kind: output, shape index: {}]  }
   0x1   :  { %s10_s17 = sshll.u32 %s526_s0, 4  ;;  %s11_s17 = int_to_ptr.hbm [resolvable:$true] %s10_s17 }
   0x2   :  { %13 = dma.hbm_to_smem %s11_s17, 16, %s477_s18, [#allocation2] }
   0x3   :  { %469 = dma.done.wait [#allocation2], 16 }
   0x4   :  { %470 = vsyncadd [#allocation2], 4294967280 }
   0x5   :  { %16 = sfence }
   0x6   :  { %17 = vsyncpa [#allocation5], 0 }
   0x7   :  { %18 = vsyncpa [#allocation8], 0 }
   0x8   :  { %19 = vsyncpa [#allocation6], 0  ;;  %s37_s21 = sshll.u32 %s528_s2, 4  ;;  %s478_s22 = smov [#allocation7]   ;;  %s38_s21 = int_to_ptr.hbm [resolvable:$true] %s37_s21 }
   0x9   :  { %s39_s23 = sshll.u32 %s478_s22, 4  ;;  %s24_s0 = sshll.u32 %s527_s1, 4  ;;  %s40_s23 = int_to_ptr.vmem [resolvable:$true] %s39_s23  ;;  %s25_s0 = int_to_ptr.hbm [resolvable:$true] %s24_s0 }
   0xa   :  { %s479_s26 = smov 64   ;;  %s480_s27 = smov 4  }
   0xb   :  { %45 = dma.hbm_to_vmem [thread:$0]  %s38_s21, 1024, %s40_s23, [#allocation8], %s479_s26, %s479_s26, %s480_s27  }
   0xc   :  { %s481_s28 = smov [#allocation4]   ;;  %s50_s6 = sshll.u32 %s529_s3, 4  ;;  %s51_s6 = int_to_ptr.hbm [resolvable:$true] %s50_s6 }
   0xd   :  { %s26_s29 = sshll.u32 %s481_s28, 4  ;;  %s482_s2 = smov [#allocation9]   ;;  %s27_s29 = int_to_ptr.vmem [resolvable:$true] %s26_s29 }
   0xe   :  { %32 = dma.hbm_to_vmem [thread:$0]  %s25_s0, 128, %s27_s29, [#allocation5], %s479_s26, %s479_s26, %s480_s27  }
   0xf   :  { %s52_s7 = sshll.u32 %s482_s2, 4  ;;  %s53_s7 = int_to_ptr.vmem [resolvable:$true] %s52_s7 }
  0x10   :  { %58 = dma.hbm_to_vmem [thread:$0]  %s51_s6, 1024, %s53_s7, [#allocation8], %s479_s26, %s479_s26, %s480_s27  }
  0x11   :  { %471 = dma.done.wait [#allocation5], 128  }
  0x12   :  { %472 = vsyncadd [#allocation5], 4294967168 }
  0x13   :  { %473 = dma.done.wait [#allocation8], 2048  }
  0x14   :  { %474 = vsyncadd [#allocation8], 4294965248  ;;  %v343_v0 = vld [vmem:[#allocation7 + $0x38] sm:$0xff]  ;;  %v342_v1 = vld [vmem:[#allocation7 + $0x30] sm:$0xff]  ;;  %s71_s1 = sld [smem:[#allocation3]]  ;;  %s483_s8 = smov [#allocation10]  }
  0x15   :  { %146 = vmatpush.bf16.msra.mxu0 %v343_v0  ;;  %v351_v2 = vld [vmem:[#allocation9 + $0x38] sm:$0xff]  ;;  %v350_v3 = vld [vmem:[#allocation9 + $0x30] sm:$0xff]  ;;  %v341_v4 = vld [vmem:[#allocation7 + $0x28] sm:$0xff]  ;;  %s266_s3 = sld [smem:[#allocation3 + $0x1]]  ;;  %s250_s9 = sshll.u32 %s483_s8, 4  ;;  %s251_s9 = int_to_ptr.vmem [resolvable:$true] %s250_s9 }
  0x16   :  { %228 = vmatpush.bf16.msra.mxu1 %v351_v2  ;;  %v349_v5 = vld [vmem:[#allocation9 + $0x28] sm:$0xff]  ;;  %v340_v6 = vld [vmem:[#allocation7 + $0x20] sm:$0xff]  ;;  %v339_v8 = vld [vmem:[#allocation7 + $0x18] sm:$0xff]  ;;  %s252_s12 = sshll.u32 %s530_s4, 4  ;;  %s484_s13 = smov 128   ;;  %s253_s12 = int_to_ptr.hbm [resolvable:$true] %s252_s12 }
  0x17   :  { %v348_v7 = vld [vmem:[#allocation9 + $0x20] sm:$0xff]  ;;  %v338_v9 = vld [vmem:[#allocation7 + $0x10] sm:$0xff]  ;;  %v337_v10 = vld [vmem:[#allocation7 + $0x8] sm:$0xff]  ;;  %s485_s14 = smov 8  }
  0x18   :  { %v336_v11 = vld [vmem:[#allocation7] sm:$0xff]  ;;  %v335_v12 = vld [vmem:[#allocation4] sm:$0xff]  ;;  %v346_v14 = vld [vmem:[#allocation9 + $0x10] sm:$0xff] }
  0x19   :  { %147 = vmatpush.bf16.msra.mxu0 %v342_v1  ;;  %v347_v13 = vld [vmem:[#allocation9 + $0x18] sm:$0xff]  ;;  %v345_v15 = vld [vmem:[#allocation9 + $0x8] sm:$0xff]  ;;  %v344_v16 = vld [vmem:[#allocation9] sm:$0xff] }
  0x1a   :  { %229 = vmatpush.bf16.msra.mxu1 %v350_v3  ;;  %v91_v18 = vstv %s71_s1 }
  0x1b   :  { %v179_v25 = vstv %s266_s3 }
  0x1d   :  { %148 = vmatpush.bf16.msra.mxu0 %v341_v4 }
  0x1e   :  { %230 = vmatpush.bf16.msra.mxu1 %v349_v5 }
  0x21   :  { %149 = vmatpush.bf16.msra.mxu0 %v340_v6 }
  0x22   :  { %231 = vmatpush.bf16.msra.mxu1 %v348_v7 }
  0x25   :  { %150 = vmatpush.bf16.msra.mxu0 %v339_v8 }
  0x26   :  { %232 = vmatpush.bf16.msra.mxu1 %v347_v13 }
  0x29   :  { %151 = vmatpush.bf16.msra.mxu0 %v338_v9 }
  0x2a   :  { %233 = vmatpush.bf16.msra.mxu1 %v346_v14 }
  0x2d   :  { %152 = vmatpush.bf16.msra.mxu0 %v337_v10 }
  0x2e   :  { %234 = vmatpush.bf16.msra.mxu1 %v345_v15 }
  0x31   :  { %153 = vmatpush.bf16.msra.mxu0 %v336_v11 }
  0x32   :  { %235 = vmatpush.bf16.msra.mxu1 %v344_v16 }
  0x34   :  { %154 = vmatmul.bf16.vlgmr.msra.gmra.mxu0 %v335_v12 }
  0xb1   :  { %v155_v17 = vpop.f32.mrf.mxu0 }
  0xb2   :  { %v156_v19 = vadd.f32 %v155_v17, %v91_v18 }
  0xb4   :  { %v160_v22 = vmax.f32 %v156_v19, 0.0 }
  0xb9   :  { %v157_v20 = vpop.f32.mrf.mxu0 }
  0xba   :  { %v158_v21 = vadd.f32 %v157_v20, %v91_v18 }
  0xbc   :  { %v161_v23 = vmax.f32 %v158_v21, 0.0 }
  0xbe   :  { %v162_v24 = vpack.c.bf16 %v161_v23, %v160_v22 }
  0xc0   :  { %236 = vmatmul.bf16.vlgmr.msra.gmra.mxu1 %v162_v24 }
 0x13d   :  { %v237_v26 = vpop.f32.mrf.mxu1 }
 0x13e   :  { %v238_v27 = vadd.f32 %v237_v26, %v179_v25 }
 0x140   :  { %v242_v28 = vmax.f32 %v238_v27, 0.0 }
 0x142   :  { %244 = vst [vmem:[#allocation10] sm:$0xff] %v242_v28 }
 0x145   :  { %v239_v29 = vpop.f32.mrf.mxu1 }
 0x146   :  { %v240_v30 = vadd.f32 %v239_v29, %v179_v25 }
 0x148   :  { %v243_v31 = vmax.f32 %v240_v30, 0.0 }
 0x14a   :  { %245 = vst [vmem:[#allocation10 + $0x8] sm:$0xff] %v243_v31 }
 0x14b   :  { %258 = dma.vmem_to_hbm [thread:$0]  %s251_s9, 256, %s253_s12, [#allocation6], %s484_s13, %s484_s13, %s485_s14  }
 0x14c   :  { %475 = dma.done.wait [#allocation6], 256  }
 0x14d   :  { %476 = vsyncadd [#allocation6], 4294967040 }
 0x14e   :  { %263 = vsyncpa [#allocation5], 1 }
 0x14f   :  { %264 = vsyncpa [#allocation8], 1 }
 0x150   :  { %265 = vsyncpa [#allocation6], 1 }

</bundles_post_ra>
